<compile_context>
chip_gen: v6e
topology: v6e:2x2x1
jax: 0.10.0
libtpu: 0.0.40
codegen_flags: <defaults>
</compile_context>

<pallas_src>
import numpy as np
import jax
import jax.numpy as jnp
from jax.experimental import pallas as pl
from jax.experimental.pallas import tpu as pltpu

# ---- hyper-parameters from CNNndpPolicySigma.__init__ defaults ----
STATE_SPACE  = 2
ACTION_SPACE = 2
N_BASIS      = 3                       # N
T_STEPS      = 5                       # T
L_SUB        = 1                       # l
TAU          = 1.0
HIDDEN       = 64
DOF          = 2                       # len(state_index)
OUTPUT_SIZE  = N_BASIS * DOF + DOF     # 8
DT           = 1.0 / (T_STEPS * L_SUB) # 0.2
TIME_STEPS   = int(round(TAU / DT)) + 1  # 6
N_EULER      = TIME_STEPS - 1            # 5
A_X          = 1.0

H1  = HIDDEN                 # policy trunk width        (64)
H3  = 3 * HIDDEN             # value trunk width         (192)
HC  = H1 + H3                # fused hidden width        (256)
L3W = H1 + ACTION_SPACE      # fused [act | value] width (66)
L4W = OUTPUT_SIZE + DOF * N_EULER        # fused [actor | F] width (18)
OUT_COLS = DOF * T_STEPS + ACTION_SPACE  # packed output lanes     (12)

# DMPParameters basis constants: c = exp(-a_x*linspace(0,1,N)), sigma2 = N^1.5/c/a_x
_C      = np.exp(-A_X * np.linspace(0.0, 1.0, N_BASIS)).astype(np.float32)
_SIGMA2 = (N_BASIS ** 1.5 / _C / A_X).astype(np.float32)

# TODO(synk): DMPIntegrator/DMPParameters source was not provided with the module;
# the DMP rollout follows the canonical NDP implementation (gaussian RBF, a_x=1,
# tau=1, per-sample alpha_z = actor[:, -1] shared by both DOFs, b_z = a_z/4).


def _build_psi_scaled():
    """[6, 10] trace-time constant. F = actor[:, 2:8] @ P gives, for Euler step i
    and dof d, column 2*i+d = sum_k w[d,k] * psi_i[k] * xs_i / sum(psi_i)."""
    P = np.zeros((DOF * N_BASIS, DOF * N_EULER), np.float32)
    xs = 1.0
    for i in range(N_EULER):
        xs = xs + (-A_X * xs * TAU) * DT          # canonical system updated before psi
        psi = np.exp(-0.5 * (xs - _C) ** 2 / _SIGMA2)
        s = xs / float(psi.sum())
        for d in range(DOF):
            for k in range(N_BASIS):
                P[d * N_BASIS + k, 2 * i + d] = psi[k] * s
    return P.astype(np.float32)


_PSI_SCALED = _build_psi_scaled()


def _policy_kernel(state_ref,
                   w1_ref, b1_ref, w2_ref, b2_ref,
                   w3_ref, b3_ref, w4_ref, b4_ref,
                   out_ref):
    f32 = jnp.float32
    x = state_ref[...] * 0.1                                   # state = state * 0.1

    # L1 (fc1 | fc1_value fused on the shared input): [TB,3] @ [3,256]
    h = jnp.tanh(jnp.dot(x, w1_ref[...], preferred_element_type=f32) + b1_ref[...])
    # L2 (block-diag fc2 | fc2_value): [TB,256] @ [256,256]
    h = jnp.tanh(jnp.dot(h, w2_ref[...], preferred_element_type=f32) + b2_ref[...])
    # L3 (block-diag fc1_mean | fc3_value): [TB,256] @ [256,66] -> [act | value]
    h3 = jnp.dot(h, w3_ref[...], preferred_element_type=f32) + b3_ref[...]
    act_t = jnp.tanh(h3[:, 0:H1])                              # tanh only on the policy part
    val = h3[:, H1:H1 + ACTION_SPACE]                          # fc3_value output (no tanh)
    # L4 (fc2_mean augmented with the RBF-basis constant): [TB,64] @ [64,18]
    h4 = jnp.dot(act_t, w4_ref[...], preferred_element_type=f32) + b4_ref[...]
    actor = h4[:, 0:OUTPUT_SIZE]                               # [goal(2) | dmp weights(6)]
    fbas = h4[:, OUTPUT_SIZE:L4W]                              # per-step forcing basis [TB,10]
    # NOTE: torch forward also computes self.sigma(act) and self.scale[t], but both
    # results are discarded (dead code), so they are skipped here.

    # ---- DMP Euler rollout (DMPIntegrator: rbf='gaussian', az=True, only_g=False) ----
    goal = actor[:, 0:DOF]                                     # inputs[:, :dim]
    y0 = x[:, 0:DOF]                                           # y0 = (state*0.1)[:, :2]
    a_z = actor[:, OUTPUT_SIZE - 1:OUTPUT_SIZE]                # alpha_z = inputs[:, -1]
    b_z = a_z * 0.25
    gm_y0 = goal - y0
    y = y0
    z = jnp.full_like(y0, 0.01) * TAU                          # z = dy0 * tau, dy0 = 0.01
    for i in range(N_EULER):                                   # 5 unrolled Euler steps
        diff = (TAU * DT) * z                                  # Y[:, i+1] - Y[:, i]
        # write directly into the packed output, dof-major / time-minor
        out_ref[:, i:i + 1] = diff[:, 0:1]
        out_ref[:, T_STEPS + i:T_STEPS + i + 1] = diff[:, 1:2]
        fx = fbas[:, 2 * i:2 * i + 2] * gm_y0                  # (w @ psi) * xs/sum(psi) * (g - y0)
        dz = a_z * (b_z * (goal - y) - z) + fx
        y = y + diff
        z = z + (TAU * DT) * dz
    out_ref[:, DOF * T_STEPS:OUT_COLS] = val                   # value head -> lanes 10..11


def init_params(key):
    keys = jax.random.split(key, 7)

    def lin(k, fin, fout, bias_val=None):
        kw, kb = jax.random.split(k)
        bound = 1.0 / np.sqrt(fin)
        w = jax.random.uniform(kw, (fin, fout), jnp.float32, -bound, bound)
        if bias_val is None:
            b = jax.random.uniform(kb, (1, fout), jnp.float32, -bound, bound)
        else:
            b = jnp.full((1, fout), bias_val, jnp.float32)
        return w, b

    w1, b1   = lin(keys[0], 3, HIDDEN, 0.1)                  # fc1   (bias = b_init_value)
    w2, b2   = lin(keys[1], HIDDEN, HIDDEN, 0.1)             # fc2
    w1m, b1m = lin(keys[2], HIDDEN, HIDDEN, 0.1)             # fc1_mean
    w2m, b2m = lin(keys[3], HIDDEN, OUTPUT_SIZE, 0.0)        # fc2_mean (bias = 0)
    w1v, b1v = lin(keys[4], 3, 3 * HIDDEN)                   # fc1_value
    w2v, b2v = lin(keys[5], 3 * HIDDEN, 3 * HIDDEN)          # fc2_value
    w3v, b3v = lin(keys[6], 3 * HIDDEN, ACTION_SPACE)        # fc3_value
    phi = jnp.ones((10, DOF), jnp.float32) * 0.5             # nn.Parameter(torch.ones(10,2)*0.5)
    return (w1, b1, w2, b2, w1m, b1m, w2m, b2m,
            w1v, b1v, w2v, b2v, w3v, b3v, phi)


def pack_params(params):
    """One-time host-side fusion of the 7 Linear layers into 4 lane-wide matmuls."""
    (w1, b1, w2, b2, w1m, b1m, w2m, b2m,
     w1v, b1v, w2v, b2v, w3v, b3v, phi) = params
    f32 = jnp.float32
    wcat1 = jnp.concatenate([w1, w1v], axis=1)                              # [3, 256]
    bcat1 = jnp.concatenate([b1, b1v], axis=1)                              # [1, 256]
    wcat2 = jnp.zeros((HC, HC), f32).at[:H1, :H1].set(w2).at[H1:, H1:].set(w2v)   # [256, 256]
    bcat2 = jnp.concatenate([b2, b2v], axis=1)                              # [1, 256]
    wcat3 = jnp.zeros((HC, L3W), f32).at[:H1, :H1].set(w1m).at[H1:, H1:].set(w3v) # [256, 66]
    bcat3 = jnp.concatenate([b1m, b3v], axis=1)                             # [1, 66]
    psi = jnp.asarray(_PSI_SCALED)                                          # [6, 10]
    wcat4 = jnp.concatenate([w2m, w2m[:, DOF:] @ psi], axis=1)              # [64, 18]
    bcat4 = jnp.concatenate([b2m, b2m[:, DOF:] @ psi], axis=1)              # [1, 18]
    return (wcat1, bcat1, wcat2, bcat2, wcat3, bcat3, wcat4, bcat4), phi


def cnn_ndp_policy_sigma_forward(state, packed, phi):
    B = state.shape[0]
    TB = B if B <= 128 else 128                       # batch tile (full block at small B)
    grid = (pl.cdiv(B, TB),)

    flops = 2 * B * (3 * HC + HC * HC + HC * L3W + H1 * L4W) + B * N_EULER * 24
    ce = pl.CostEstimate(
        flops=flops,
        transcendentals=B * (2 * HC + H1),
        bytes_accessed=int(sum(int(np.prod(p.shape)) for p in packed) * 4
                           + B * (3 + OUT_COLS) * 4),
    )

    out = pl.pallas_call(
        _policy_kernel,
        out_shape=jax.ShapeDtypeStruct((B, OUT_COLS), jnp.float32),
        grid=grid,
        in_specs=[pl.BlockSpec((TB, 3), lambda i: (i, 0))]
                 + [pl.BlockSpec(p.shape, lambda i: (0, 0)) for p in packed],
        out_specs=pl.BlockSpec((TB, OUT_COLS), lambda i: (i, 0)),
        compiler_params=pltpu.CompilerParams(dimension_semantics=("parallel",)),
        cost_estimate=ce,
    )(state, *packed)

    # glue (pure reshapes / broadcast, no compute):
    a = out[:, :DOF * T_STEPS].reshape(B, DOF, T_STEPS)                     # [B, 2, T]
    value = jnp.broadcast_to(out[:, DOF * T_STEPS:, None], (B, DOF, T_STEPS))   # [B, 2, T]
    # sigma = self.phi[t], t = (state[:, 2] / 5).long(); tiny gather done in the wrapper.
    # torch would raise on out-of-range t; we clamp to [0, 9].
    t_idx = jnp.clip((state[:, 2] / 5.0).astype(jnp.int32), 0, 9)
    sigma = jnp.take(phi, t_idx, axis=0)[:, :, None]                        # [B, 2, 1]
    return a, sigma, value


if __name__ == "__main__":
    key = jax.random.PRNGKey(0)
    kp, ks1, ks2 = jax.random.split(key, 3)
    params = init_params(kp)
    packed, phi = pack_params(params)

    B = 8
    xy = jax.random.uniform(ks1, (B, 2), jnp.float32, -1.0, 1.0)       # positions
    tcol = jax.random.uniform(ks2, (B, 1), jnp.float32, 0.0, 49.0)     # "time" -> phi index in [0,10)
    state = jnp.concatenate([xy, tcol], axis=1)                        # [B, 3]

    fwd = jax.jit(cnn_ndp_policy_sigma_forward)
    a, sigma, value = fwd(state, packed, phi)
    jax.block_until_ready((a, sigma, value))

    assert a.shape == (B, DOF, T_STEPS)
    assert sigma.shape == (B, DOF, 1)
    assert value.shape == (B, DOF, T_STEPS)
    assert bool(jnp.all(jnp.isfinite(a))) and bool(jnp.all(jnp.isfinite(value)))
    print("KERNEL_OK")
</pallas_src>

<mosaic_0001>
module attributes {stable_mosaic.version = 11 : i64} {
  func.func @_policy_kernel(%arg0: i32, %arg1: memref<8x3xf32, #tpu.memory_space<vmem>>, %arg2: memref<3x256xf32, #tpu.memory_space<vmem>>, %arg3: memref<1x256xf32, #tpu.memory_space<vmem>>, %arg4: memref<256x256xf32, #tpu.memory_space<vmem>>, %arg5: memref<1x256xf32, #tpu.memory_space<vmem>>, %arg6: memref<256x66xf32, #tpu.memory_space<vmem>>, %arg7: memref<1x66xf32, #tpu.memory_space<vmem>>, %arg8: memref<64x18xf32, #tpu.memory_space<vmem>>, %arg9: memref<1x18xf32, #tpu.memory_space<vmem>>, %arg10: memref<8x12xf32, #tpu.memory_space<vmem>>) attributes {dimension_semantics = [#tpu.dimension_semantics<parallel>], iteration_bounds = array<i64: 1>, scalar_prefetch = 0 : i64, scratch_operands = 0 : i64, tpu.core_type = #tpu.core_type<tc>, window_params = [{transform_indices = @transform_0, window_bounds = array<i64: 8, 3>}, {pipeline_mode = #tpu.pipeline_mode<synchronous>, transform_indices = @transform_1, window_bounds = array<i64: 3, 256>}, {pipeline_mode = #tpu.pipeline_mode<synchronous>, transform_indices = @transform_2, window_bounds = array<i64: 1, 256>}, {pipeline_mode = #tpu.pipeline_mode<synchronous>, transform_indices = @transform_3, window_bounds = array<i64: 256, 256>}, {pipeline_mode = #tpu.pipeline_mode<synchronous>, transform_indices = @transform_4, window_bounds = array<i64: 1, 256>}, {pipeline_mode = #tpu.pipeline_mode<synchronous>, transform_indices = @transform_5, window_bounds = array<i64: 256, 66>}, {pipeline_mode = #tpu.pipeline_mode<synchronous>, transform_indices = @transform_6, window_bounds = array<i64: 1, 66>}, {pipeline_mode = #tpu.pipeline_mode<synchronous>, transform_indices = @transform_7, window_bounds = array<i64: 64, 18>}, {pipeline_mode = #tpu.pipeline_mode<synchronous>, transform_indices = @transform_8, window_bounds = array<i64: 1, 18>}, {transform_indices = @transform_9, window_bounds = array<i64: 8, 12>}]} {
    %c0 = arith.constant 0 : index
    %c0_0 = arith.constant 0 : index
    %0 = vector.load %arg1[%c0, %c0_0] : memref<8x3xf32, #tpu.memory_space<vmem>>, vector<8x3xf32>
    %cst = arith.constant 1.000000e-01 : f32
    %1 = vector.broadcast %cst : f32 to vector<8x3xf32>
    %2 = arith.mulf %0, %1 : vector<8x3xf32>
    %c0_1 = arith.constant 0 : index
    %c0_2 = arith.constant 0 : index
    %3 = vector.load %arg2[%c0_1, %c0_2] : memref<3x256xf32, #tpu.memory_space<vmem>>, vector<3x256xf32>
    %cst_3 = arith.constant dense<0.000000e+00> : vector<8x256xf32>
    %4 = tpu.matmul %2, %3, %cst_3 {dimension_numbers = #tpu.dot_dimension_numbers<[1], [0], [0], [1], [0, 0, 1, 1], [], []>} : vector<8x3xf32>, vector<3x256xf32>, vector<8x256xf32> -> vector<8x256xf32>
    %c0_4 = arith.constant 0 : index
    %c0_5 = arith.constant 0 : index
    %5 = vector.load %arg3[%c0_4, %c0_5] : memref<1x256xf32, #tpu.memory_space<vmem>>, vector<1x256xf32>
    %6 = vector.broadcast %5 : vector<1x256xf32> to vector<8x256xf32>
    %7 = arith.addf %4, %6 : vector<8x256xf32>
    %8 = math.tanh %7 : vector<8x256xf32>
    %c0_6 = arith.constant 0 : index
    %c0_7 = arith.constant 0 : index
    %9 = vector.load %arg4[%c0_6, %c0_7] : memref<256x256xf32, #tpu.memory_space<vmem>>, vector<256x256xf32>
    %cst_8 = arith.constant dense<0.000000e+00> : vector<8x256xf32>
    %10 = tpu.matmul %8, %9, %cst_8 {dimension_numbers = #tpu.dot_dimension_numbers<[1], [0], [0], [1], [0, 0, 1, 1], [], []>} : vector<8x256xf32>, vector<256x256xf32>, vector<8x256xf32> -> vector<8x256xf32>
    %c0_9 = arith.constant 0 : index
    %c0_10 = arith.constant 0 : index
    %11 = vector.load %arg5[%c0_9, %c0_10] : memref<1x256xf32, #tpu.memory_space<vmem>>, vector<1x256xf32>
    %12 = vector.broadcast %11 : vector<1x256xf32> to vector<8x256xf32>
    %13 = arith.addf %10, %12 : vector<8x256xf32>
    %14 = math.tanh %13 : vector<8x256xf32>
    %c0_11 = arith.constant 0 : index
    %c0_12 = arith.constant 0 : index
    %15 = vector.load %arg6[%c0_11, %c0_12] : memref<256x66xf32, #tpu.memory_space<vmem>>, vector<256x66xf32>
    %cst_13 = arith.constant dense<0.000000e+00> : vector<8x66xf32>
    %16 = tpu.matmul %14, %15, %cst_13 {dimension_numbers = #tpu.dot_dimension_numbers<[1], [0], [0], [1], [0, 0, 1, 1], [], []>} : vector<8x256xf32>, vector<256x66xf32>, vector<8x66xf32> -> vector<8x66xf32>
    %c0_14 = arith.constant 0 : index
    %c0_15 = arith.constant 0 : index
    %17 = vector.load %arg7[%c0_14, %c0_15] : memref<1x66xf32, #tpu.memory_space<vmem>>, vector<1x66xf32>
    %18 = vector.broadcast %17 : vector<1x66xf32> to vector<8x66xf32>
    %19 = arith.addf %16, %18 : vector<8x66xf32>
    %20 = vector.extract_strided_slice %19 {offsets = [0, 0], sizes = [8, 64], strides = [1, 1]} : vector<8x66xf32> to vector<8x64xf32>
    %21 = math.tanh %20 : vector<8x64xf32>
    %22 = vector.extract_strided_slice %19 {offsets = [0, 64], sizes = [8, 2], strides = [1, 1]} : vector<8x66xf32> to vector<8x2xf32>
    %c0_16 = arith.constant 0 : index
    %c0_17 = arith.constant 0 : index
    %23 = vector.load %arg8[%c0_16, %c0_17] : memref<64x18xf32, #tpu.memory_space<vmem>>, vector<64x18xf32>
    %cst_18 = arith.constant dense<0.000000e+00> : vector<8x18xf32>
    %24 = tpu.matmul %21, %23, %cst_18 {dimension_numbers = #tpu.dot_dimension_numbers<[1], [0], [0], [1], [0, 0, 1, 1], [], []>} : vector<8x64xf32>, vector<64x18xf32>, vector<8x18xf32> -> vector<8x18xf32>
    %c0_19 = arith.constant 0 : index
    %c0_20 = arith.constant 0 : index
    %25 = vector.load %arg9[%c0_19, %c0_20] : memref<1x18xf32, #tpu.memory_space<vmem>>, vector<1x18xf32>
    %26 = vector.broadcast %25 : vector<1x18xf32> to vector<8x18xf32>
    %27 = arith.addf %24, %26 : vector<8x18xf32>
    %28 = vector.extract_strided_slice %27 {offsets = [0, 0], sizes = [8, 8], strides = [1, 1]} : vector<8x18xf32> to vector<8x8xf32>
    %29 = vector.extract_strided_slice %27 {offsets = [0, 8], sizes = [8, 10], strides = [1, 1]} : vector<8x18xf32> to vector<8x10xf32>
    %30 = vector.extract_strided_slice %28 {offsets = [0, 0], sizes = [8, 2], strides = [1, 1]} : vector<8x8xf32> to vector<8x2xf32>
    %31 = vector.extract_strided_slice %2 {offsets = [0, 0], sizes = [8, 2], strides = [1, 1]} : vector<8x3xf32> to vector<8x2xf32>
    %32 = vector.extract_strided_slice %28 {offsets = [0, 7], sizes = [8, 1], strides = [1, 1]} : vector<8x8xf32> to vector<8x1xf32>
    %cst_21 = arith.constant 2.500000e-01 : f32
    %33 = vector.broadcast %cst_21 : f32 to vector<8x1xf32>
    %34 = arith.mulf %32, %33 : vector<8x1xf32>
    %35 = arith.subf %30, %31 : vector<8x2xf32>
    %cst_22 = arith.constant 0.00999999977 : f32
    %36 = vector.broadcast %cst_22 : f32 to vector<8x2xf32>
    %cst_23 = arith.constant 1.000000e+00 : f32
    %37 = vector.broadcast %cst_23 : f32 to vector<8x2xf32>
    %38 = arith.mulf %36, %37 : vector<8x2xf32>
    %cst_24 = arith.constant 2.000000e-01 : f32
    %39 = vector.broadcast %cst_24 : f32 to vector<8x2xf32>
    %40 = arith.mulf %39, %38 : vector<8x2xf32>
    %41 = vector.extract_strided_slice %40 {offsets = [0, 0], sizes = [8, 1], strides = [1, 1]} : vector<8x2xf32> to vector<8x1xf32>
    %c0_25 = arith.constant 0 : index
    %c0_26 = arith.constant 0 : index
    %42 = vector.load %arg10[%c0_25, %c0_26] : memref<8x12xf32, #tpu.memory_space<vmem>>, vector<8x1xf32>
    tpu.vector_store %arg10[%c0_25, %c0_26], %41 {strides = array<i32>} : memref<8x12xf32, #tpu.memory_space<vmem>>, vector<8x1xf32>,
    %43 = vector.extract_strided_slice %40 {offsets = [0, 1], sizes = [8, 1], strides = [1, 1]} : vector<8x2xf32> to vector<8x1xf32>
    %c0_27 = arith.constant 0 : index
    %c5 = arith.constant 5 : index
    %44 = vector.load %arg10[%c0_27, %c5] : memref<8x12xf32, #tpu.memory_space<vmem>>, vector<8x1xf32>
    tpu.vector_store %arg10[%c0_27, %c5], %43 {strides = array<i32>} : memref<8x12xf32, #tpu.memory_space<vmem>>, vector<8x1xf32>,
    %45 = vector.extract_strided_slice %29 {offsets = [0, 0], sizes = [8, 2], strides = [1, 1]} : vector<8x10xf32> to vector<8x2xf32>
    %46 = arith.mulf %45, %35 : vector<8x2xf32>
    %47 = arith.subf %30, %31 : vector<8x2xf32>
    %48 = vector.broadcast %34 : vector<8x1xf32> to vector<8x2xf32>
    %49 = arith.mulf %48, %47 : vector<8x2xf32>
    %50 = arith.subf %49, %38 : vector<8x2xf32>
    %51 = vector.broadcast %32 : vector<8x1xf32> to vector<8x2xf32>
    %52 = arith.mulf %51, %50 : vector<8x2xf32>
    %53 = arith.addf %52, %46 : vector<8x2xf32>
    %54 = arith.addf %31, %40 : vector<8x2xf32>
    %cst_28 = arith.constant 2.000000e-01 : f32
    %55 = vector.broadcast %cst_28 : f32 to vector<8x2xf32>
    %56 = arith.mulf %55, %53 : vector<8x2xf32>
    %57 = arith.addf %38, %56 : vector<8x2xf32>
    %cst_29 = arith.constant 2.000000e-01 : f32
    %58 = vector.broadcast %cst_29 : f32 to vector<8x2xf32>
    %59 = arith.mulf %58, %57 : vector<8x2xf32>
    %60 = vector.extract_strided_slice %59 {offsets = [0, 0], sizes = [8, 1], strides = [1, 1]} : vector<8x2xf32> to vector<8x1xf32>
    %c0_30 = arith.constant 0 : index
    %c1 = arith.constant 1 : index
    %61 = vector.load %arg10[%c0_30, %c1] : memref<8x12xf32, #tpu.memory_space<vmem>>, vector<8x1xf32>
    tpu.vector_store %arg10[%c0_30, %c1], %60 {strides = array<i32>} : memref<8x12xf32, #tpu.memory_space<vmem>>, vector<8x1xf32>,
    %62 = vector.extract_strided_slice %59 {offsets = [0, 1], sizes = [8, 1], strides = [1, 1]} : vector<8x2xf32> to vector<8x1xf32>
    %c0_31 = arith.constant 0 : index
    %c6 = arith.constant 6 : index
    %63 = vector.load %arg10[%c0_31, %c6] : memref<8x12xf32, #tpu.memory_space<vmem>>, vector<8x1xf32>
    tpu.vector_store %arg10[%c0_31, %c6], %62 {strides = array<i32>} : memref<8x12xf32, #tpu.memory_space<vmem>>, vector<8x1xf32>,
    %64 = vector.extract_strided_slice %29 {offsets = [0, 2], sizes = [8, 2], strides = [1, 1]} : vector<8x10xf32> to vector<8x2xf32>
    %65 = arith.mulf %64, %35 : vector<8x2xf32>
    %66 = arith.subf %30, %54 : vector<8x2xf32>
    %67 = vector.broadcast %34 : vector<8x1xf32> to vector<8x2xf32>
    %68 = arith.mulf %67, %66 : vector<8x2xf32>
    %69 = arith.subf %68, %57 : vector<8x2xf32>
    %70 = vector.broadcast %32 : vector<8x1xf32> to vector<8x2xf32>
    %71 = arith.mulf %70, %69 : vector<8x2xf32>
    %72 = arith.addf %71, %65 : vector<8x2xf32>
    %73 = arith.addf %54, %59 : vector<8x2xf32>
    %cst_32 = arith.constant 2.000000e-01 : f32
    %74 = vector.broadcast %cst_32 : f32 to vector<8x2xf32>
    %75 = arith.mulf %74, %72 : vector<8x2xf32>
    %76 = arith.addf %57, %75 : vector<8x2xf32>
    %cst_33 = arith.constant 2.000000e-01 : f32
    %77 = vector.broadcast %cst_33 : f32 to vector<8x2xf32>
    %78 = arith.mulf %77, %76 : vector<8x2xf32>
    %79 = vector.extract_strided_slice %78 {offsets = [0, 0], sizes = [8, 1], strides = [1, 1]} : vector<8x2xf32> to vector<8x1xf32>
    %c0_34 = arith.constant 0 : index
    %c2 = arith.constant 2 : index
    %80 = vector.load %arg10[%c0_34, %c2] : memref<8x12xf32, #tpu.memory_space<vmem>>, vector<8x1xf32>
    tpu.vector_store %arg10[%c0_34, %c2], %79 {strides = array<i32>} : memref<8x12xf32, #tpu.memory_space<vmem>>, vector<8x1xf32>,
    %81 = vector.extract_strided_slice %78 {offsets = [0, 1], sizes = [8, 1], strides = [1, 1]} : vector<8x2xf32> to vector<8x1xf32>
    %c0_35 = arith.constant 0 : index
    %c7 = arith.constant 7 : index
    %82 = vector.load %arg10[%c0_35, %c7] : memref<8x12xf32, #tpu.memory_space<vmem>>, vector<8x1xf32>
    tpu.vector_store %arg10[%c0_35, %c7], %81 {strides = array<i32>} : memref<8x12xf32, #tpu.memory_space<vmem>>, vector<8x1xf32>,
    %83 = vector.extract_strided_slice %29 {offsets = [0, 4], sizes = [8, 2], strides = [1, 1]} : vector<8x10xf32> to vector<8x2xf32>
    %84 = arith.mulf %83, %35 : vector<8x2xf32>
    %85 = arith.subf %30, %73 : vector<8x2xf32>
    %86 = vector.broadcast %34 : vector<8x1xf32> to vector<8x2xf32>
    %87 = arith.mulf %86, %85 : vector<8x2xf32>
    %88 = arith.subf %87, %76 : vector<8x2xf32>
    %89 = vector.broadcast %32 : vector<8x1xf32> to vector<8x2xf32>
    %90 = arith.mulf %89, %88 : vector<8x2xf32>
    %91 = arith.addf %90, %84 : vector<8x2xf32>
    %92 = arith.addf %73, %78 : vector<8x2xf32>
    %cst_36 = arith.constant 2.000000e-01 : f32
    %93 = vector.broadcast %cst_36 : f32 to vector<8x2xf32>
    %94 = arith.mulf %93, %91 : vector<8x2xf32>
    %95 = arith.addf %76, %94 : vector<8x2xf32>
    %cst_37 = arith.constant 2.000000e-01 : f32
    %96 = vector.broadcast %cst_37 : f32 to vector<8x2xf32>
    %97 = arith.mulf %96, %95 : vector<8x2xf32>
    %98 = vector.extract_strided_slice %97 {offsets = [0, 0], sizes = [8, 1], strides = [1, 1]} : vector<8x2xf32> to vector<8x1xf32>
    %c0_38 = arith.constant 0 : index
    %c3 = arith.constant 3 : index
    %99 = vector.load %arg10[%c0_38, %c3] : memref<8x12xf32, #tpu.memory_space<vmem>>, vector<8x1xf32>
    tpu.vector_store %arg10[%c0_38, %c3], %98 {strides = array<i32>} : memref<8x12xf32, #tpu.memory_space<vmem>>, vector<8x1xf32>,
    %100 = vector.extract_strided_slice %97 {offsets = [0, 1], sizes = [8, 1], strides = [1, 1]} : vector<8x2xf32> to vector<8x1xf32>
    %c0_39 = arith.constant 0 : index
    %c8 = arith.constant 8 : index
    %101 = vector.load %arg10[%c0_39, %c8] : memref<8x12xf32, #tpu.memory_space<vmem>>, vector<8x1xf32>
    tpu.vector_store %arg10[%c0_39, %c8], %100 {strides = array<i32>} : memref<8x12xf32, #tpu.memory_space<vmem>>, vector<8x1xf32>,
    %102 = vector.extract_strided_slice %29 {offsets = [0, 6], sizes = [8, 2], strides = [1, 1]} : vector<8x10xf32> to vector<8x2xf32>
    %103 = arith.mulf %102, %35 : vector<8x2xf32>
    %104 = arith.subf %30, %92 : vector<8x2xf32>
    %105 = vector.broadcast %34 : vector<8x1xf32> to vector<8x2xf32>
    %106 = arith.mulf %105, %104 : vector<8x2xf32>
    %107 = arith.subf %106, %95 : vector<8x2xf32>
    %108 = vector.broadcast %32 : vector<8x1xf32> to vector<8x2xf32>
    %109 = arith.mulf %108, %107 : vector<8x2xf32>
    %110 = arith.addf %109, %103 : vector<8x2xf32>
    %cst_40 = arith.constant 2.000000e-01 : f32
    %111 = vector.broadcast %cst_40 : f32 to vector<8x2xf32>
    %112 = arith.mulf %111, %110 : vector<8x2xf32>
    %113 = arith.addf %95, %112 : vector<8x2xf32>
    %cst_41 = arith.constant 2.000000e-01 : f32
    %114 = vector.broadcast %cst_41 : f32 to vector<8x2xf32>
    %115 = arith.mulf %114, %113 : vector<8x2xf32>
    %116 = vector.extract_strided_slice %115 {offsets = [0, 0], sizes = [8, 1], strides = [1, 1]} : vector<8x2xf32> to vector<8x1xf32>
    %c0_42 = arith.constant 0 : index
    %c4 = arith.constant 4 : index
    %117 = vector.load %arg10[%c0_42, %c4] : memref<8x12xf32, #tpu.memory_space<vmem>>, vector<8x1xf32>
    tpu.vector_store %arg10[%c0_42, %c4], %116 {strides = array<i32>} : memref<8x12xf32, #tpu.memory_space<vmem>>, vector<8x1xf32>,
    %118 = vector.extract_strided_slice %115 {offsets = [0, 1], sizes = [8, 1], strides = [1, 1]} : vector<8x2xf32> to vector<8x1xf32>
    %c0_43 = arith.constant 0 : index
    %c9 = arith.constant 9 : index
    %119 = vector.load %arg10[%c0_43, %c9] : memref<8x12xf32, #tpu.memory_space<vmem>>, vector<8x1xf32>
    tpu.vector_store %arg10[%c0_43, %c9], %118 {strides = array<i32>} : memref<8x12xf32, #tpu.memory_space<vmem>>, vector<8x1xf32>,
    %c0_44 = arith.constant 0 : index
    %c10 = arith.constant 10 : index
    %120 = vector.load %arg10[%c0_44, %c10] : memref<8x12xf32, #tpu.memory_space<vmem>>, vector<8x2xf32>
    tpu.vector_store %arg10[%c0_44, %c10], %22 {strides = array<i32>} : memref<8x12xf32, #tpu.memory_space<vmem>>, vector<8x2xf32>,
    return
  }
  func.func @transform_0(%arg0: i32) -> (i32, i32) {
    %c0_i32 = arith.constant 0 : i32
    %c0_i32_0 = arith.constant 0 : i32
    return %arg0, %c0_i32 : i32, i32
  }
  func.func @transform_1(%arg0: i32) -> (i32, i32) {
    %c0_i32 = arith.constant 0 : i32
    %c0_i32_0 = arith.constant 0 : i32
    %c0_i32_1 = arith.constant 0 : i32
    return %c0_i32, %c0_i32_0 : i32, i32
  }
  func.func @transform_2(%arg0: i32) -> (i32, i32) {
    %c0_i32 = arith.constant 0 : i32
    %c0_i32_0 = arith.constant 0 : i32
    %c0_i32_1 = arith.constant 0 : i32
    return %c0_i32, %c0_i32_0 : i32, i32
  }
  func.func @transform_3(%arg0: i32) -> (i32, i32) {
    %c0_i32 = arith.constant 0 : i32
    %c0_i32_0 = arith.constant 0 : i32
    %c0_i32_1 = arith.constant 0 : i32
    return %c0_i32, %c0_i32_0 : i32, i32
  }
  func.func @transform_4(%arg0: i32) -> (i32, i32) {
    %c0_i32 = arith.constant 0 : i32
    %c0_i32_0 = arith.constant 0 : i32
    %c0_i32_1 = arith.constant 0 : i32
    return %c0_i32, %c0_i32_0 : i32, i32
  }
  func.func @transform_5(%arg0: i32) -> (i32, i32) {
    %c0_i32 = arith.constant 0 : i32
    %c0_i32_0 = arith.constant 0 : i32
    %c0_i32_1 = arith.constant 0 : i32
    return %c0_i32, %c0_i32_0 : i32, i32
  }
  func.func @transform_6(%arg0: i32) -> (i32, i32) {
    %c0_i32 = arith.constant 0 : i32
    %c0_i32_0 = arith.constant 0 : i32
    %c0_i32_1 = arith.constant 0 : i32
    return %c0_i32, %c0_i32_0 : i32, i32
  }
  func.func @transform_7(%arg0: i32) -> (i32, i32) {
    %c0_i32 = arith.constant 0 : i32
    %c0_i32_0 = arith.constant 0 : i32
    %c0_i32_1 = arith.constant 0 : i32
    return %c0_i32, %c0_i32_0 : i32, i32
  }
  func.func @transform_8(%arg0: i32) -> (i32, i32) {
    %c0_i32 = arith.constant 0 : i32
    %c0_i32_0 = arith.constant 0 : i32
    %c0_i32_1 = arith.constant 0 : i32
    return %c0_i32, %c0_i32_0 : i32, i32
  }
  func.func @transform_9(%arg0: i32) -> (i32, i32) {
    %c0_i32 = arith.constant 0 : i32
    %c0_i32_0 = arith.constant 0 : i32
    return %arg0, %c0_i32 : i32, i32
  }
}

</mosaic_0001>

<bundles_post_ra>
// kernel: cnn_ndp_policy_sigma_forward.1
= control target key start
LH: loop header
LB: loop body
LE: loop exit
PB: predicated region body
PF: predicated region fallthrough
CT: control target
= control target key end

     0   :  { %14 = vsyncpa [#allocation3], 0  ;;  %s759_s30 = smov [#allocation2]   ;;  %s1039_s0 = inlined_call_operand.vmem [shape: f32[8,3], index: 0, kind: input, shape index: {}]   ;;  %s1040_s1 = inlined_call_operand.vmem [shape: f32[3,256], index: 1, kind: input, shape index: {}]   ;;  %s1041_s2 = inlined_call_operand.vmem [shape: f32[1,256], index: 2, kind: input, shape index: {}]   ;;  %s1042_s3 = inlined_call_operand.hbm [shape: f32[256,256], index: 3, kind: input, shape index: {}]   ;;  %s1043_s4 = inlined_call_operand.vmem [shape: f32[1,256], index: 4, kind: input, shape index: {}]   ;;  %s1044_s5 = inlined_call_operand.vmem [shape: f32[256,66], index: 5, kind: input, shape index: {}]   ;;  %s1045_s6 = inlined_call_operand.vmem [shape: f32[1,66], index: 6, kind: input, shape index: {}]   ;;  %s1046_s7 = inlined_call_operand.vmem [shape: f32[64,18], index: 7, kind: input, shape index: {}]   ;;  %s1047_s8 = inlined_call_operand.vmem [shape: f32[1,18], index: 8, kind: input, shape index: {}]   ;;  %s1048_s9 = inlined_call_operand.vmem [shape: f32[8,12], index: 9, kind: output, shape index: {}]  }
   0x1   :  { %s26_s10 = sshll.u32 %s759_s30, 4  ;;  %s27_s10 = int_to_ptr.vmem [resolvable:$true] %s26_s10 }
   0x2   :  { %s745_s11 = scalar_lea.vmem %s27_s10, 8192  ;;  %p750_p1 = scmp.lt.s32.totalorder %s27_s10, %s27_s10 }
   0x3   :  { %p746_p0 = scmp.ne.s32.totalorder %s27_s10, %s745_s11  ;;  %p751_p2 = scmp.lt.s32.totalorder %s745_s11, %s745_s11 }
   0x5   :  { %p752_p3 = por %p751_p2, %p750_p1 }
   0x7   :  { %p753_p4 = pnand %p752_p3, %p746_p0 }
   0x9   :  { %756 = shalt.err (!%p753_p4)
}
   0xa   :  { %s760_s12 = smov 256   ;;  %s761_s13 = smov 16  }
   0xb   :  { %32 = dma.hbm_to_vmem [thread:$0]  %s1042_s3, 8192, %s27_s10, [#allocation3], %s760_s12, %s760_s12, %s761_s13  }
   0xc   :  { %757 = dma.done.wait [#allocation3], 8192  }
   0xd   :  { %758 = vsyncadd [#allocation3], 4294959104  ;;  %v762_v0 = vmov 0.0   ;;  %v48_v1 = vld [vmem:[%s1040_s1] sm:$0x77]  ;;  %vm67_vm0 = vcmask 1042432  }
   0xe   :  { %136 = vmatprep.mubr.f32.mxu0 %v762_v0  ;;  %v46_v2 = vld [vmem:[%s1039_s0] sm:$0xff]  ;;  %v176_v3 = vld [vmem:[#allocation2 + $0xf8] sm:$0xff]  ;;  %v62_v4 = vcombine.high %v48_v1, %v48_v1  ;;  %v175_v6 = vld [vmem:[#allocation2 + $0xf0] sm:$0xff]  ;;  %vm63_vm1 = vcmask 23552   ;;  %vm763_vm2 = vmmov 0   ;;  %vm419_vm3 = vcmask 523264  }
   0xf   :  { %v842_v5 = vmul.f32 0.1, %v46_v2  ;;  %221 = vmatprep.subr.mxu1 %v176_v3  ;;  %v174_v7 = vld [vmem:[#allocation2 + $0xe8] sm:$0xff]  ;;  %v173_v8 = vld [vmem:[#allocation2 + $0xe0] sm:$0xff]  ;;  %v172_v9 = vld [vmem:[#allocation2 + $0xd8] sm:$0xff]  ;;  %s766_s27 = smov 8  }
  0x10   :  { %222 = vmatpush1.msra.mxu1 %v175_v6  ;;  %631 = vmatprep.subr.msk.mxu0 %vm67_vm0, %v62_v4  ;;  %v171_v10 = vld [vmem:[#allocation2 + $0xd0] sm:$0xff]  ;;  %v170_v11 = vld [vmem:[#allocation2 + $0xc8] sm:$0xff]  ;;  %v169_v12 = vld [vmem:[#allocation2 + $0xc0] sm:$0xff]  ;;  %s767_s28 = smov 14   ;;  %s768_s29 = smov 10   ;;  %vm495_vm4 = vcmask 7168  }
  0x11   :  { %223 = vmatprep.subr.mxu1 %v174_v7  ;;  %632 = vmatpush1.msk.msra.mxu0 %vm67_vm0, %v48_v1  ;;  %v168_v13 = vld [vmem:[#allocation2 + $0xb8] sm:$0xff]  ;;  %v167_v14 = vld [vmem:[#allocation2 + $0xb0] sm:$0xff]  ;;  %v166_v15 = vld [vmem:[#allocation2 + $0xa8] sm:$0xff]  ;;  %s770_s30 = smov 116   ;;  %s771_s10 = smov 118   ;;  %vm497_vm5 = vcmask 48168  }
  0x12   :  { %224 = vmatpush1.msra.mxu1 %v173_v8  ;;  %633 = vmatmul.mubr.msk.f32.vlgmr.msra.gmra.mxu0 %vm63_vm1, %v842_v5  ;;  %v165_v16 = vld [vmem:[#allocation2 + $0xa0] sm:$0xff]  ;;  %v164_v17 = vld [vmem:[#allocation2 + $0x98] sm:$0xff]  ;;  %v163_v18 = vld [vmem:[#allocation2 + $0x90] sm:$0xff]  ;;  %s772_s11 = smov 114   ;;  %s775_s15 = smov 1   ;;  %vm530_vm6 = vcmask 15368  }
  0x13   :  { %225 = vmatprep.subr.mxu1 %v172_v9  ;;  %v162_v19 = vld [vmem:[#allocation2 + $0x88] sm:$0xff]  ;;  %v161_v20 = vld [vmem:[#allocation2 + $0x80] sm:$0xff]  ;;  %v160_v21 = vld [vmem:[#allocation2 + $0x78] sm:$0xff]  ;;  %s776_s16 = smov 6   ;;  %s777_s17 = smov 2   ;;  %vm535_vm7 = vcmask 56368  }
  0x14   :  { %226 = vmatpush1.msra.mxu1 %v171_v10  ;;  %v159_v22 = vld [vmem:[#allocation2 + $0x70] sm:$0xff]  ;;  %v158_v23 = vld [vmem:[#allocation2 + $0x68] sm:$0xff]  ;;  %v157_v24 = vld [vmem:[#allocation2 + $0x60] sm:$0xff]  ;;  %s778_s18 = smov 7   ;;  %s779_s19 = smov 3   ;;  %vm558_vm8 = vcmask 23568  }
  0x15   :  { %227 = vmatprep.subr.mxu1 %v170_v11  ;;  %v156_v25 = vld [vmem:[#allocation2 + $0x58] sm:$0xff]  ;;  %v155_v26 = vld [vmem:[#allocation2 + $0x50] sm:$0xff]  ;;  %v154_v27 = vld [vmem:[#allocation2 + $0x48] sm:$0xff]  ;;  %s780_s0 = smov 4   ;;  %s781_s1 = smov 74   ;;  %vm563_vm9 = vcmask 64568  }
  0x16   :  { %228 = vmatpush1.msra.mxu1 %v169_v12  ;;  %v153_v28 = vld [vmem:[#allocation2 + $0x40] sm:$0xff]  ;;  %v152_v29 = vld [vmem:[#allocation2 + $0x38] sm:$0xff]  ;;  %v151_v30 = vld [vmem:[#allocation2 + $0x30] sm:$0xff]  ;;  %vm586_vm10 = vcmask 31768   ;;  %vm591_vm11 = vcmask 72768   ;;  %vm613_vm12 = vcmask 39968  }
  0x17   :  { %229 = vmatprep.subr.mxu1 %v168_v13  ;;  %v150_v31 = vld [vmem:[#allocation2 + $0x28] sm:$0xff]  ;;  %v149_v32 = vld [vmem:[#allocation2 + $0x20] sm:$0xff]  ;;  %v148_v33 = vld [vmem:[#allocation2 + $0x18] sm:$0xff]  ;;  %vm618_vm13 = vcmask 80968   ;;  %vm624_vm14 = vcmask 97360  }
  0x18   :  { %230 = vmatpush1.msra.mxu1 %v167_v14  ;;  %v147_v34 = vld [vmem:[#allocation2 + $0x10] sm:$0xff]  ;;  %v146_v35 = vld [vmem:[#allocation2 + $0x8] sm:$0xff]  ;;  %v145_v36 = vld [vmem:[#allocation2] sm:$0xff] }
  0x19   :  { %231 = vmatprep.subr.mxu1 %v166_v15  ;;  %v208_v37 = vld [vmem:[#allocation2 + $0x1f8] sm:$0xff]  ;;  %v207_v38 = vld [vmem:[#allocation2 + $0x1f0] sm:$0xff]  ;;  %v206_v39 = vld [vmem:[#allocation2 + $0x1e8] sm:$0xff] }
  0x1a   :  { %232 = vmatpush1.msra.mxu1 %v165_v16  ;;  %v205_v40 = vld [vmem:[#allocation2 + $0x1e0] sm:$0xff]  ;;  %v204_v41 = vld [vmem:[#allocation2 + $0x1d8] sm:$0xff]  ;;  %v203_v42 = vld [vmem:[#allocation2 + $0x1d0] sm:$0xff] }
  0x1b   :  { %233 = vmatprep.subr.mxu1 %v164_v17  ;;  %v202_v43 = vld [vmem:[#allocation2 + $0x1c8] sm:$0xff]  ;;  %v201_v44 = vld [vmem:[#allocation2 + $0x1c0] sm:$0xff]  ;;  %v200_v45 = vld [vmem:[#allocation2 + $0x1b8] sm:$0xff] }
  0x1c   :  { %234 = vmatpush1.msra.mxu1 %v163_v18  ;;  %v199_v46 = vld [vmem:[#allocation2 + $0x1b0] sm:$0xff]  ;;  %v198_v47 = vld [vmem:[#allocation2 + $0x1a8] sm:$0xff]  ;;  %v197_v48 = vld [vmem:[#allocation2 + $0x1a0] sm:$0xff] }
  0x1d   :  { %235 = vmatprep.subr.mxu1 %v162_v19  ;;  %v196_v49 = vld [vmem:[#allocation2 + $0x198] sm:$0xff]  ;;  %v195_v50 = vld [vmem:[#allocation2 + $0x190] sm:$0xff]  ;;  %v194_v51 = vld [vmem:[#allocation2 + $0x188] sm:$0xff]  ;;  %v51_v19 = vlaneseq }
  0x1e   :  { %236 = vmatpush1.msra.mxu1 %v161_v20  ;;  %v193_v52 = vld [vmem:[#allocation2 + $0x180] sm:$0xff]  ;;  %v192_v53 = vld [vmem:[#allocation2 + $0x178] sm:$0xff]  ;;  %v191_v54 = vld [vmem:[#allocation2 + $0x170] sm:$0xff] }
  0x1f   :  { %237 = vmatprep.subr.mxu1 %v160_v21  ;;  %v190_v55 = vld [vmem:[#allocation2 + $0x168] sm:$0xff]  ;;  %v189_v56 = vld [vmem:[#allocation2 + $0x160] sm:$0xff]  ;;  %v188_v57 = vld [vmem:[#allocation2 + $0x158] sm:$0xff]  ;;  %v52_v20 = vshrl.u32 %v51_v19, 7 }
  0x20   :  { %238 = vmatpush1.msra.mxu1 %v159_v22  ;;  %v187_v58 = vld [vmem:[#allocation2 + $0x150] sm:$0xff]  ;;  %v186_v59 = vld [vmem:[#allocation2 + $0x148] sm:$0xff]  ;;  %v185_v60 = vld [vmem:[#allocation2 + $0x140] sm:$0xff] }
  0x21   :  { %239 = vmatprep.subr.mxu1 %v158_v23  ;;  %v184_v61 = vld [vmem:[#allocation2 + $0x138] sm:$0xff]  ;;  %v183_v62 = vld [vmem:[#allocation2 + $0x130] sm:$0xff]  ;;  %v182_v63 = vld [vmem:[#allocation2 + $0x128] sm:$0xff]  ;;  %v53_v21 = vsub.s32 0, %v52_v20  ;;  %v57_v23 = vsub.s32 1, %v52_v20 }
  0x22   :  { %240 = vmatpush1.msra.mxu1 %v157_v24  ;;  %v181_v1 = vld [vmem:[#allocation2 + $0x120] sm:$0xff]  ;;  %v180_v2 = vld [vmem:[#allocation2 + $0x118] sm:$0xff]  ;;  %v179_v3 = vld [vmem:[#allocation2 + $0x110] sm:$0xff] }
  0x23   :  { %241 = vmatprep.subr.mxu1 %v156_v25  ;;  %v178_v4 = vld [vmem:[#allocation2 + $0x108] sm:$0xff]  ;;  %v177_v6 = vld [vmem:[#allocation2 + $0x100] sm:$0xff]  ;;  %v325_v7 = vld [vmem:[%s1044_s5 + $0xf8] sm:$0xff] }
  0x24   :  { %242 = vmatpush1.msra.mxu1 %v155_v26  ;;  %v309_v8 = vld [vmem:[%s1044_s5 + $0x78] sm:$0xff]  ;;  %v324_v9 = vld [vmem:[%s1044_s5 + $0xf0] sm:$0xff]  ;;  %638 = vmatprep.subr.mxu0 %v325_v7  ;;  %v323_v11 = vld [vmem:[%s1044_s5 + $0xe8] sm:$0xff] }
  0x25   :  { %243 = vmatprep.subr.mxu1 %v154_v27  ;;  %v308_v10 = vld [vmem:[%s1044_s5 + $0x70] sm:$0xff]  ;;  %639 = vmatpush3.msra.mxu0 %v309_v8  ;;  %v307_v12 = vld [vmem:[%s1044_s5 + $0x68] sm:$0xff]  ;;  %v322_v13 = vld [vmem:[%s1044_s5 + $0xe0] sm:$0xff] }
  0x26   :  { %244 = vmatpush1.msra.mxu1 %v153_v28  ;;  %640 = vmatprep.subr.mxu0 %v324_v9  ;;  %v306_v14 = vld [vmem:[%s1044_s5 + $0x60] sm:$0xff]  ;;  %v321_v15 = vld [vmem:[%s1044_s5 + $0xd8] sm:$0xff]  ;;  %v320_v17 = vld [vmem:[%s1044_s5 + $0xd0] sm:$0xff] }
  0x27   :  { %245 = vmatprep.subr.mxu1 %v152_v29  ;;  %641 = vmatpush3.msra.mxu0 %v308_v10  ;;  %v305_v16 = vld [vmem:[%s1044_s5 + $0x58] sm:$0xff]  ;;  %v304_v18 = vld [vmem:[%s1044_s5 + $0x50] sm:$0xff]  ;;  %v49_v22 = vld [vmem:[%s1041_s2] sm:$0x3] }
  0x28   :  { %246 = vmatpush1.msra.mxu1 %v151_v30  ;;  %642 = vmatprep.subr.mxu0 %v323_v11  ;;  %v54_v24 = vrot.slane %v49_v22, %v53_v21  ;;  %v58_v25 = vrot.slane %v49_v22, %v57_v23  ;;  %v634_v8 = vld [vmem:[%s1045_s6] ss:$0 sm:$0xff]  ;;  %s765_s6 = smov 12  }
  0x29   :  { %247 = vmatprep.subr.mxu1 %v150_v31  ;;  %643 = vmatpush3.msra.mxu0 %v307_v12 }
  0x2a   :  { %248 = vmatpush1.msra.mxu1 %v149_v32  ;;  %644 = vmatprep.subr.mxu0 %v322_v13  ;;  %v319_v32 = vld [vmem:[%s1044_s5 + $0xc8] sm:$0xff]  ;;  %v764_v13 = vmov 7  }
  0x2b   :  { %249 = vmatprep.subr.mxu1 %v148_v33  ;;  %645 = vmatpush3.msra.mxu0 %v306_v14  ;;  %v303_v33 = vld [vmem:[%s1044_s5 + $0x48] sm:$0xff] }
  0x2c   :  { %250 = vmatpush1.msra.mxu1 %v147_v34  ;;  %646 = vmatprep.subr.mxu0 %v321_v15  ;;  %v318_v34 = vld [vmem:[%s1044_s5 + $0xc0] sm:$0xff] }
  0x2d   :  { %251 = vmatprep.subr.mxu1 %v146_v35  ;;  %647 = vmatpush3.msra.mxu0 %v305_v16  ;;  %v302_v35 = vld [vmem:[%s1044_s5 + $0x40] sm:$0xff] }
  0x2e   :  { %252 = vmatpush1.msra.mxu1 %v145_v36  ;;  %648 = vmatprep.subr.mxu0 %v320_v17  ;;  %v317_v36 = vld [vmem:[%s1044_s5 + $0xb8] sm:$0xff] }
  0x2f   :  { %253 = vmatprep.subr.mxu1 %v208_v37  ;;  %649 = vmatpush3.msra.mxu0 %v304_v18  ;;  %v301_v37 = vld [vmem:[%s1044_s5 + $0x38] sm:$0xff] }
  0x30   :  { %254 = vmatpush2.msra.mxu1 %v207_v38  ;;  %650 = vmatprep.subr.mxu0 %v319_v32  ;;  %v316_v38 = vld [vmem:[%s1044_s5 + $0xb0] sm:$0xff]  ;;  %v522_v32 = vadd.f32 0.002, %v842_v5 }
  0x31   :  { %255 = vmatprep.subr.mxu1 %v206_v39  ;;  %651 = vmatpush3.msra.mxu0 %v303_v33  ;;  %v300_v39 = vld [vmem:[%s1044_s5 + $0x30] sm:$0xff] }
  0x32   :  { %256 = vmatpush2.msra.mxu1 %v205_v40  ;;  %652 = vmatprep.subr.mxu0 %v318_v34  ;;  %v315_v40 = vld [vmem:[%s1044_s5 + $0xa8] sm:$0xff] }
  0x33   :  { %257 = vmatprep.subr.mxu1 %v204_v41  ;;  %653 = vmatpush3.msra.mxu0 %v302_v35  ;;  %v299_v41 = vld [vmem:[%s1044_s5 + $0x28] sm:$0xff] }
  0x34   :  { %258 = vmatpush2.msra.mxu1 %v203_v42  ;;  %654 = vmatprep.subr.mxu0 %v317_v36  ;;  %v314_v42 = vld [vmem:[%s1044_s5 + $0xa0] sm:$0xff] }
  0x35   :  { %259 = vmatprep.subr.mxu1 %v202_v43  ;;  %655 = vmatpush3.msra.mxu0 %v301_v37  ;;  %v298_v43 = vld [vmem:[%s1044_s5 + $0x20] sm:$0xff] }
  0x36   :  { %260 = vmatpush2.msra.mxu1 %v201_v44  ;;  %656 = vmatprep.subr.mxu0 %v316_v38  ;;  %v313_v44 = vld [vmem:[%s1044_s5 + $0x98] sm:$0xff] }
  0x37   :  { %261 = vmatprep.subr.mxu1 %v200_v45  ;;  %657 = vmatpush3.msra.mxu0 %v300_v39  ;;  %v297_v45 = vld [vmem:[%s1044_s5 + $0x18] sm:$0xff] }
  0x38   :  { %262 = vmatpush2.msra.mxu1 %v199_v46  ;;  %658 = vmatprep.subr.mxu0 %v315_v40  ;;  %v312_v46 = vld [vmem:[%s1044_s5 + $0x90] sm:$0xff] }
  0x39   :  { %263 = vmatprep.subr.mxu1 %v198_v47  ;;  %659 = vmatpush3.msra.mxu0 %v299_v41  ;;  %v296_v47 = vld [vmem:[%s1044_s5 + $0x10] sm:$0xff] }
  0x3a   :  { %264 = vmatpush2.msra.mxu1 %v197_v48  ;;  %660 = vmatprep.subr.mxu0 %v314_v42  ;;  %v311_v48 = vld [vmem:[%s1044_s5 + $0x88] sm:$0xff] }
  0x3b   :  { %265 = vmatprep.subr.mxu1 %v196_v49  ;;  %661 = vmatpush3.msra.mxu0 %v298_v43  ;;  %v295_v49 = vld [vmem:[%s1044_s5 + $0x8] sm:$0xff] }
  0x3c   :  { %266 = vmatpush2.msra.mxu1 %v195_v50  ;;  %662 = vmatprep.subr.mxu0 %v313_v44  ;;  %v310_v50 = vld [vmem:[%s1044_s5 + $0x80] sm:$0xff] }
  0x3d   :  { %267 = vmatprep.subr.mxu1 %v194_v51  ;;  %663 = vmatpush3.msra.mxu0 %v297_v45  ;;  %v294_v51 = vld [vmem:[%s1044_s5] sm:$0xff] }
  0x3e   :  { %268 = vmatpush2.msra.mxu1 %v193_v52  ;;  %664 = vmatprep.subr.mxu0 %v312_v46  ;;  %v209_v52 = vld [vmem:[%s1043_s4] sm:$0x3]  ;;  %s774_s4 = smov 5  }
  0x3f   :  { %269 = vmatprep.subr.mxu1 %v192_v53  ;;  %665 = vmatpush3.msra.mxu0 %v296_v47  ;;  %v214_v53 = vrot.slane %v209_v52, %v53_v21 }
  0x40   :  { %270 = vmatpush2.msra.mxu1 %v191_v54  ;;  %666 = vmatprep.subr.mxu0 %v311_v48  ;;  %v218_v54 = vrot.slane %v209_v52, %v57_v23 }
  0x41   :  { %271 = vmatprep.subr.mxu1 %v190_v55  ;;  %667 = vmatpush3.msra.mxu0 %v295_v49 }
  0x42   :  { %272 = vmatpush2.msra.mxu1 %v189_v56  ;;  %668 = vmatprep.subr.mxu0 %v310_v50 }
  0x43   :  { %273 = vmatprep.subr.mxu1 %v188_v57  ;;  %669 = vmatpush3.msra.mxu0 %v294_v51 }
  0x44   :  { %274 = vmatpush2.msra.mxu1 %v187_v58  ;;  %682 = vmatprep.subr.mxu0 %v762_v0 }
  0x45   :  { %275 = vmatprep.subr.mxu1 %v186_v59  ;;  %725 = vset.pattern.permute.xlu1 %v764_v13 }
  0x46   :  { %276 = vmatpush2.msra.mxu1 %v185_v60  ;;  %724 = vset.pattern.permute.xlu0 %v764_v13 }
  0x47   :  { %277 = vmatprep.subr.mxu1 %v184_v61  ;;  %v411_v61 = vld [vmem:[%s1046_s7 + $0x38] sm:$0xff] }
  0x48   :  { %278 = vmatpush2.msra.mxu1 %v183_v62  ;;  %v410_v62 = vld [vmem:[%s1046_s7 + $0x30] sm:$0xff] }
  0x49   :  { %279 = vmatprep.subr.mxu1 %v182_v63  ;;  %v409_v63 = vld [vmem:[%s1046_s7 + $0x28] sm:$0xff] }
  0x4a   :  { %280 = vmatpush2.msra.mxu1 %v181_v1  ;;  %v408_v1 = vld [vmem:[%s1046_s7 + $0x20] sm:$0xff] }
  0x4b   :  { %281 = vmatprep.subr.mxu1 %v180_v2  ;;  %v407_v2 = vld [vmem:[%s1046_s7 + $0x18] sm:$0xff] }
  0x4c   :  { %282 = vmatpush2.msra.mxu1 %v179_v3  ;;  %v406_v3 = vld [vmem:[%s1046_s7 + $0x10] sm:$0xff] }
  0x4d   :  { %283 = vmatprep.subr.mxu1 %v178_v4  ;;  %v405_v4 = vld [vmem:[%s1046_s7 + $0x8] sm:$0xff] }
  0x4e   :  { %284 = vmatpush2.msra.mxu1 %v177_v6  ;;  %v404_v6 = vld [vmem:[%s1046_s7] sm:$0xff] }
  0xd2   :  { %v138_v26 = vpop.f32.mrf.mxu0 }
  0xd3   :  { %v139_v27 = vadd.f32 %v138_v26, %v54_v24 }
  0xd4   :  { %v140_v28 = vpop.f32.mrf.mxu0 }
  0xd5   :  { %v141_v29 = vadd.f32 %v140_v28, %v58_v25 }
  0xd7   :  { %727 = vtanh.f32 %v141_v29 }
  0xd8   :  { %729 = vtanh.f32 %v139_v27  ;;  %v773_v27 = vmov 0.002  }
  0xd9   :  { %496 = vst.msk [vmem:[%s1048_s9] sm:$0xff] %vm495_vm4, %v773_v27 }
  0xda   :  { %498 = vst.msk [vmem:[%s1048_s9] sm:$0xff] %vm497_vm5, %v773_v27 }
  0xe4   :  { %v728_v30 = vpop.eup %727 }
  0xe5   :  { %v730_v31 = vpop.eup %729  ;;  %285 = vmatprep.mubr.f32.mxu1 %v728_v30 }
  0xe6   :  { %286 = vmatmul.mubr.f32.vlgmr.msra.gmra.mxu1 %v730_v31 }
 0x1a6   :  { %v287_v55 = vpop.f32.mrf.mxu1 }
 0x1a7   :  { %v288_v56 = vadd.f32 %v287_v55, %v214_v53 }
 0x1a8   :  { %v289_v57 = vpop.f32.mrf.mxu1 }
 0x1a9   :  { %v290_v58 = vadd.f32 %v289_v57, %v218_v54 }
 0x1ab   :  { %731 = vtanh.f32 %v290_v58 }
 0x1ac   :  { %733 = vtanh.f32 %v288_v56 }
 0x1b8   :  { %v732_v59 = vpop.eup %731 }
 0x1b9   :  { %v734_v60 = vpop.eup %733  ;;  %397 = vmatprep.mubr.f32.mxu0 %v732_v59 }
 0x1ba   :  { %398 = vmatmul.mubr.f32.vlgmr.msra.gmra.mxu0 %v734_v60 }
 0x1bb   :  { %683 = vmatpush3.msra.mxu0 %v411_v61  ;;  %698 = vmatprep.mubr.msk.f32.mxu0 %vm763_vm2, %v762_v0 }
 0x1bc   :  { %684 = vmatprep.subr.mxu0 %v762_v0 }
 0x1bd   :  { %685 = vmatpush3.msra.mxu0 %v410_v62 }
 0x1be   :  { %686 = vmatprep.subr.mxu0 %v762_v0 }
 0x1bf   :  { %687 = vmatpush3.msra.mxu0 %v409_v63 }
 0x1c0   :  { %688 = vmatprep.subr.mxu0 %v762_v0 }
 0x1c1   :  { %689 = vmatpush3.msra.mxu0 %v408_v1 }
 0x1c2   :  { %690 = vmatprep.subr.mxu0 %v762_v0 }
 0x1c3   :  { %691 = vmatpush3.msra.mxu0 %v407_v2 }
 0x1c4   :  { %692 = vmatprep.subr.mxu0 %v762_v0 }
 0x1c5   :  { %693 = vmatpush3.msra.mxu0 %v406_v3 }
 0x1c6   :  { %694 = vmatprep.subr.mxu0 %v762_v0 }
 0x1c7   :  { %695 = vmatpush3.msra.mxu0 %v405_v4 }
 0x1c8   :  { %696 = vmatprep.subr.mxu0 %v762_v0  ;;  %v635_v0 = vld [vmem:[%s1047_s8] ss:$0 sm:$0xff]  ;;  %s769_s8 = smov 120  }
 0x1c9   :  { %697 = vmatpush3.msra.mxu0 %v404_v6 }
 0x27a   :  { %v670_v7 = vpop.f32.mrf.mxu0 }
 0x27c   :  { %v671_v9 = vpop.f32.mrf.mxu0 }
 0x27d   :  { %v672_v10 = vadd.f32 %v671_v9, %v670_v7 }
 0x27f   :  { %v983_v11 = vadd.f32 %v672_v10, %v634_v8 }
 0x281   :  { %735 = vtanh.f32 %v983_v11 }
 0x28e   :  { %v736_v12 = vpop.eup %735 }
 0x28f   :  { %699 = vmatmul.mubr.msk.f32.vlgmr.msra.gmra.mxu0 %vm419_vm3, %v736_v12 }
 0x34f   :  { %v489_v14 = vpop.f32.mrf.mxu0 }
 0x350   :  { %v989_v15 = vadd.f32 %v635_v0, %v489_v14 }
 0x351   :  { %v700_v16 = vpop.f32.mrf.mxu0 }
 0x352   :  { %v494_v17 = vsub.f32 %v989_v15, %v842_v5  ;;  %v493_v18 = vmul.f32 0.25, %v989_v15  ;;  %v541_v36 = vsub.f32 %v989_v15, %v522_v32 }
 0x354   :  { %565 = vrot.lane.b32.xlu1 %v494_v17, %s765_s6  ;;  %500 = vrot.lane.b32.xlu0 %v494_v17, %s766_s27 }
 0x358   :  { %593 = vrot.lane.b32.xlu1 %v494_v17, %s767_s28  ;;  %537 = vrot.lane.b32.xlu0 %v494_v17, %s768_s29 }
 0x35c   :  { %513 = vperm.xlu1 %725, %v989_v15   ;;  %506 = vperm.xlu0 %724, %v493_v18  }
 0x3c6   :  { %v566_v19 = vpop.permute.xlu1 %565  ;;  %v501_v20 = vpop.permute.xlu0 %500 }
 0x3c7   :  { %v503_v21 = vmul.f32 %v501_v20, %v989_v15  ;;  %v568_v23 = vmul.f32 %v566_v19, %v989_v15 }
 0x3c9   :  { %518 = vrot.lane.b32.xlu1 %v503_v21, %s769_s8 }
 0x3ca   :  { %v538_v22 = vpop.permute.xlu0 %537  ;;  %v594_v25 = vpop.permute.xlu1 %593 }
 0x3cb   :  { %v540_v24 = vmul.f32 %v538_v22, %v989_v15  ;;  %v596_v26 = vmul.f32 %v594_v25, %v989_v15 }
 0x3cd   :  { %574 = vrot.lane.b32.xlu1 %v568_v23, %s770_s30  ;;  %546 = vrot.lane.b32.xlu0 %v540_v24, %s771_s10 }
 0x3d1   :  { %602 = vrot.lane.b32.xlu0 %v596_v26, %s772_s11 }
 0x3d7   :  { %v507_v28 = vpop.permute.xlu0 %506  ;;  %v514_v31 = vpop.permute.xlu1 %513 }
 0x3d8   :  { %v509_v29 = vmul.f32 %v507_v28, %v494_v17  ;;  %v542_v38 = vmul.f32 %v541_v36, %v507_v28 }
 0x3da   :  { %v637_v30 = vadd.f32 -0.01, %v509_v29 }
 0x3dc   :  { %v516_v33 = vmul.f32 %v637_v30, %v514_v31 }
 0x43b   :  { %v519_v34 = vpop.permute.xlu1 %518 }
 0x43c   :  { %v521_v35 = vadd.f32 %v519_v34, %v516_v33 }
 0x43e   :  { %v523_v37 = vmul.f32 0.2, %v521_v35 }
 0x43f   :  { %v547_v44 = vpop.permute.xlu0 %546  ;;  %v575_v53 = vpop.permute.xlu1 %574 }
 0x440   :  { %v524_v39 = vadd.f32 0.01, %v523_v37 }
 0x442   :  { %v525_v40 = vmul.f32 0.2, %v524_v39  ;;  %v543_v41 = vsub.f32 %v542_v38, %v524_v39 }
 0x443   :  { %v603_v62 = vpop.permute.xlu0 %602 }
 0x444   :  { %v550_v42 = vadd.f32 %v525_v40, %v522_v32  ;;  %v544_v43 = vmul.f32 %v543_v41, %v514_v31  ;;  %532 = vrot.lane.b32.xlu0 %v525_v40, %s774_s4  ;;  %527 = vrot.lane.b32.xlu1 %v525_v40, %s775_s15 }
 0x446   :  { %v569_v45 = vsub.f32 %v989_v15, %v550_v42  ;;  %v549_v5 = vadd.f32 %v547_v44, %v544_v43 }
 0x448   :  { %v551_v46 = vmul.f32 0.2, %v549_v5  ;;  %v570_v47 = vmul.f32 %v569_v45, %v507_v28 }
 0x44a   :  { %v552_v48 = vadd.f32 %v551_v46, %v524_v39 }
 0x44c   :  { %v553_v49 = vmul.f32 0.2, %v552_v48  ;;  %v571_v50 = vsub.f32 %v570_v47, %v552_v48 }
 0x44e   :  { %v572_v51 = vmul.f32 %v571_v50, %v514_v31  ;;  %v578_v52 = vadd.f32 %v553_v49, %v550_v42  ;;  %560 = vrot.lane.b32.xlu0 %v553_v49, %s776_s16  ;;  %555 = vrot.lane.b32.xlu1 %v553_v49, %s777_s17 }
 0x450   :  { %v577_v54 = vadd.f32 %v575_v53, %v572_v51  ;;  %v597_v55 = vsub.f32 %v989_v15, %v578_v52 }
 0x452   :  { %v579_v56 = vmul.f32 0.2, %v577_v54  ;;  %v598_v58 = vmul.f32 %v597_v55, %v507_v28 }
 0x454   :  { %v580_v57 = vadd.f32 %v579_v56, %v552_v48 }
 0x456   :  { %v599_v59 = vsub.f32 %v598_v58, %v580_v57  ;;  %v581_v60 = vmul.f32 0.2, %v580_v57 }
 0x458   :  { %v600_v61 = vmul.f32 %v599_v59, %v514_v31  ;;  %588 = vrot.lane.b32.xlu0 %v581_v60, %s778_s18  ;;  %583 = vrot.lane.b32.xlu1 %v581_v60, %s779_s19 }
 0x45a   :  { %v605_v63 = vadd.f32 %v603_v62, %v600_v61 }
 0x45c   :  { %v606_v1 = vmul.f32 0.2, %v605_v63 }
 0x45e   :  { %v607_v2 = vadd.f32 %v606_v1, %v580_v57 }
 0x460   :  { %v608_v3 = vmul.f32 0.2, %v607_v2 }
 0x462   :  { %615 = vrot.lane.b32.xlu0 %v608_v3, %s766_s27  ;;  %610 = vrot.lane.b32.xlu1 %v608_v3, %s780_s0 }
 0x466   :  { %621 = vrot.lane.b32.xlu1 %v983_v11, %s781_s1 }
 0x4b6   :  { %v528_v4 = vpop.permute.xlu1 %527  ;;  %v533_v6 = vpop.permute.xlu0 %532 }
 0x4b7   :  { %531 = vst.msk [vmem:[%s1048_s9] sm:$0xff] %vm530_vm6, %v528_v4 }
 0x4b8   :  { %536 = vst.msk [vmem:[%s1048_s9] sm:$0xff] %vm535_vm7, %v533_v6 }
 0x4c0   :  { %v556_v7 = vpop.permute.xlu1 %555  ;;  %v561_v8 = vpop.permute.xlu0 %560 }
 0x4c1   :  { %559 = vst.msk [vmem:[%s1048_s9] sm:$0xff] %vm558_vm8, %v556_v7 }
 0x4c2   :  { %564 = vst.msk [vmem:[%s1048_s9] sm:$0xff] %vm563_vm9, %v561_v8 }
 0x4ca   :  { %v584_v9 = vpop.permute.xlu1 %583  ;;  %v589_v10 = vpop.permute.xlu0 %588 }
 0x4cb   :  { %587 = vst.msk [vmem:[%s1048_s9] sm:$0xff] %vm586_vm10, %v584_v9 }
 0x4cc   :  { %592 = vst.msk [vmem:[%s1048_s9] sm:$0xff] %vm591_vm11, %v589_v10 }
 0x4d4   :  { %v611_v11 = vpop.permute.xlu1 %610  ;;  %v616_v12 = vpop.permute.xlu0 %615 }
 0x4d5   :  { %614 = vst.msk [vmem:[%s1048_s9] sm:$0xff] %vm613_vm12, %v611_v11 }
 0x4d6   :  { %619 = vst.msk [vmem:[%s1048_s9] sm:$0xff] %vm618_vm13, %v616_v12 }
 0x4d8   :  { %v622_v13 = vpop.permute.xlu1 %621 }
 0x4d9   :  { %625 = vst.msk [vmem:[%s1048_s9] sm:$0xff] %vm624_vm14, %v622_v13 }
 0x4da   :  { %630 = vsyncpa [#allocation3], 1 }

</bundles_post_ra>
